<compile_context>
chip_gen: v5e
topology: v5e:2x2
jax: 0.10.0
libtpu: 0.0.40
codegen_flags: <defaults>
</compile_context>

<pallas_src>
import math
import jax
import jax.numpy as jnp
from jax.experimental import pallas as pl
from jax.experimental.pallas import tpu as pltpu


# ---------------------------------------------------------------------------
# Fused kernel: all heads of one batch element + output Linear epilogue
# ---------------------------------------------------------------------------
def _attn_fc_kernel(q_ref, k_ref, v_ref, wt_ref, b_ref, o_ref, coef_ref):
    # q_ref/k_ref/v_ref: (S, D)      wt_ref: (D, D) (= W^T, grid-resident)
    # b_ref: (1, D)                  o_ref:  (S, D)   coef_ref: (H, S, S)
    S, D = q_ref.shape
    H = coef_ref.shape[0]
    d_k = D // H
    scale = 1.0 / math.sqrt(d_k)

    acc = jnp.zeros((S, D), dtype=jnp.float32)
    for h in range(H):  # H is small and static -> fully unrolled
        lo = h * d_k

        # Fold 1/sqrt(d_k) into q (O(S*d_k) multiply instead of O(S*S)).
        q_h = q_ref[:, lo:lo + d_k] * scale          # native dtype
        k_h = k_ref[:, lo:lo + d_k]
        v_h = v_ref[:, lo:lo + d_k]

        # score = q_h @ k_h^T : contract the last dims directly (no transpose).
        score = jax.lax.dot_general(
            q_h, k_h,
            dimension_numbers=(((1,), (1,)), ((), ())),
            preferred_element_type=jnp.float32,
        )

        # Numerically stable softmax in f32; reciprocal on the (idle) EUP slot.
        score = score - jnp.max(score, axis=-1, keepdims=True)
        e = jnp.exp(score)
        coef = e * pl.reciprocal(jnp.sum(e, axis=-1, keepdims=True), approx=True)
        coef_ref[h] = coef.astype(coef_ref.dtype)

        # z_h = coef @ v_h, then fused FC row-block: acc += z_h @ W^T[lo:lo+d_k, :]
        z_h = jnp.dot(coef.astype(v_h.dtype), v_h,
                      preferred_element_type=jnp.float32)
        wt_h = wt_ref[lo:lo + d_k, :]
        acc = acc + jnp.dot(z_h.astype(wt_h.dtype), wt_h,
                            preferred_element_type=jnp.float32)

    # Lane-dense (S, D) output slab + bias.
    o_ref[...] = (acc + b_ref[...].astype(jnp.float32)).astype(o_ref.dtype)


# ---------------------------------------------------------------------------
# Wrapper: no layout-shuffling transposes, everything happens in the kernel
# ---------------------------------------------------------------------------
def attention_forward(query, key, value, fc_w, fc_b, num_head):
    B, S, D = query.shape
    assert D % num_head == 0
    H = num_head

    wt = fc_w.T                 # (D, D): kernel computes x @ W^T
    b2 = fc_b.reshape(1, D)     # (1, D)

    sq = pl.Squeezed()
    qkv_spec = pl.BlockSpec((sq, S, D), lambda b: (b, 0, 0))

    out, coef = pl.pallas_call(
        _attn_fc_kernel,
        out_shape=(
            jax.ShapeDtypeStruct((B, S, D), query.dtype),
            jax.ShapeDtypeStruct((B, H, S, S), jnp.float32),
        ),
        grid_spec=pltpu.PrefetchScalarGridSpec(
            num_scalar_prefetch=0,
            grid=(B,),
            in_specs=[
                qkv_spec,                                     # query
                qkv_spec,                                     # key
                qkv_spec,                                     # value
                pl.BlockSpec((D, D), lambda b: (0, 0)),       # W^T (resident)
                pl.BlockSpec((1, D), lambda b: (0, 0)),       # bias (resident)
            ],
            out_specs=[
                pl.BlockSpec((sq, S, D), lambda b: (b, 0, 0)),      # FC output
                pl.BlockSpec((sq, H, S, S), lambda b: (b, 0, 0, 0)),  # coef
            ],
        ),
        compiler_params=pltpu.CompilerParams(
            dimension_semantics=("parallel",),
            vmem_limit_bytes=64 * 1024 * 1024,
        ),
    )(query, key, value, wt, b2)

    return out, coef


# ---------------------------------------------------------------------------
# Pure-JAX reference (mirrors the PyTorch forward exactly)
# ---------------------------------------------------------------------------
def attention_reference(query, key, value, fc_w, fc_b, num_head):
    B, S, D = query.shape
    d_k = D // num_head
    qh = jnp.transpose(query.reshape(B, S, num_head, d_k), (0, 2, 1, 3))
    kh = jnp.transpose(key.reshape(B, S, num_head, d_k), (0, 2, 1, 3))
    vh = jnp.transpose(value.reshape(B, S, num_head, d_k), (0, 2, 1, 3))
    score = jnp.einsum("bhqd,bhkd->bhqk", qh, kh) / math.sqrt(d_k)
    coef = jax.nn.softmax(score, axis=-1)
    z = jnp.einsum("bhqk,bhkd->bhqd", coef, vh)
    z = jnp.transpose(z, (0, 2, 1, 3)).reshape(B, S, D)
    return z @ fc_w.T + fc_b, coef


if __name__ == "__main__":
    B, S, D = 2, 8, 32
    num_head = 4

    key0 = jax.random.PRNGKey(0)
    kq, kk, kv, kw, kb = jax.random.split(key0, 5)

    query = jax.random.normal(kq, (B, S, D), dtype=jnp.float32)
    key_ = jax.random.normal(kk, (B, S, D), dtype=jnp.float32)
    value = jax.random.normal(kv, (B, S, D), dtype=jnp.float32)

    # nn.Linear(D, D) default init: U(-1/sqrt(D), 1/sqrt(D)), deterministic here.
    bound = 1.0 / math.sqrt(D)
    fc_w = jax.random.uniform(kw, (D, D), jnp.float32, -bound, bound)
    fc_b = jax.random.uniform(kb, (D,), jnp.float32, -bound, bound)

    out, coef = attention_forward(query, key_, value, fc_w, fc_b, num_head)
    out = jax.block_until_ready(out)
    coef = jax.block_until_ready(coef)

    ref_out, ref_coef = attention_reference(query, key_, value, fc_w, fc_b, num_head)
    assert out.shape == (B, S, D)
    assert coef.shape == (B, num_head, S, S)
    # approx=True reciprocal (EUP) introduces a tiny, acceptable numeric delta.
    assert jnp.allclose(out, ref_out, atol=2e-3, rtol=2e-3)
    assert jnp.allclose(coef, ref_coef, atol=2e-3, rtol=2e-3)

    print("KERNEL_OK")
</pallas_src>

<mosaic_0001>
module attributes {stable_mosaic.version = 11 : i64} {
  func.func @_attn_fc_kernel(%arg0: i32, %arg1: memref<1x8x32xf32, #tpu.memory_space<vmem>>, %arg2: memref<1x8x32xf32, #tpu.memory_space<vmem>>, %arg3: memref<1x8x32xf32, #tpu.memory_space<vmem>>, %arg4: memref<32x32xf32, #tpu.memory_space<vmem>>, %arg5: memref<1x32xf32, #tpu.memory_space<vmem>>, %arg6: memref<1x8x32xf32, #tpu.memory_space<vmem>>, %arg7: memref<1x4x8x8xf32, #tpu.memory_space<vmem>>) attributes {dimension_semantics = [#tpu.dimension_semantics<parallel>], iteration_bounds = array<i64: 2>, scalar_prefetch = 0 : i64, scratch_operands = 0 : i64, tpu.core_type = #tpu.core_type<tc>, window_params = [{transform_indices = @transform_0, window_bounds = array<i64: 1, 8, 32>}, {transform_indices = @transform_1, window_bounds = array<i64: 1, 8, 32>}, {transform_indices = @transform_2, window_bounds = array<i64: 1, 8, 32>}, {pipeline_mode = #tpu.pipeline_mode<synchronous>, transform_indices = @transform_3, window_bounds = array<i64: 32, 32>}, {pipeline_mode = #tpu.pipeline_mode<synchronous>, transform_indices = @transform_4, window_bounds = array<i64: 1, 32>}, {transform_indices = @transform_5, window_bounds = array<i64: 1, 8, 32>}, {transform_indices = @transform_6, window_bounds = array<i64: 1, 4, 8, 8>}]} {
    %cst = arith.constant 0.000000e+00 : f32
    %0 = vector.broadcast %cst : f32 to vector<8x32xf32>
    %c0 = arith.constant 0 : index
    %c0_0 = arith.constant 0 : index
    %c0_1 = arith.constant 0 : index
    %1 = vector.load %arg1[%c0, %c0_0, %c0_1] : memref<1x8x32xf32, #tpu.memory_space<vmem>>, vector<1x8x8xf32>
    %2 = vector.shape_cast %1 : vector<1x8x8xf32> to vector<8x8xf32>
    %cst_2 = arith.constant 0.353553385 : f32
    %3 = vector.broadcast %cst_2 : f32 to vector<8x8xf32>
    %4 = arith.mulf %2, %3 : vector<8x8xf32>
    %c0_3 = arith.constant 0 : index
    %c0_4 = arith.constant 0 : index
    %c0_5 = arith.constant 0 : index
    %5 = vector.load %arg2[%c0_3, %c0_4, %c0_5] : memref<1x8x32xf32, #tpu.memory_space<vmem>>, vector<1x8x8xf32>
    %6 = vector.shape_cast %5 : vector<1x8x8xf32> to vector<8x8xf32>
    %c0_6 = arith.constant 0 : index
    %c0_7 = arith.constant 0 : index
    %c0_8 = arith.constant 0 : index
    %7 = vector.load %arg3[%c0_6, %c0_7, %c0_8] : memref<1x8x32xf32, #tpu.memory_space<vmem>>, vector<1x8x8xf32>
    %8 = vector.shape_cast %7 : vector<1x8x8xf32> to vector<8x8xf32>
    %cst_9 = arith.constant dense<0.000000e+00> : vector<8x8xf32>
    %9 = tpu.matmul %4, %6, %cst_9 {dimension_numbers = #tpu.dot_dimension_numbers<[1], [1], [0], [0], [0, 0, 1, 0], [], []>} : vector<8x8xf32>, vector<8x8xf32>, vector<8x8xf32> -> vector<8x8xf32>
    %cst_10 = arith.constant dense<0xFF800000> : vector<8xf32>
    %10 = vector.multi_reduction <maximumf>, %9, %cst_10 [1] : vector<8x8xf32> to vector<8xf32>
    %11 = vector.shape_cast %10 : vector<8xf32> to vector<8x1xf32>
    %12 = vector.broadcast %11 : vector<8x1xf32> to vector<8x8xf32>
    %13 = arith.subf %9, %12 : vector<8x8xf32>
    %14 = math.exp %13 : vector<8x8xf32>
    %cst_11 = arith.constant dense<0.000000e+00> : vector<8xf32>
    %15 = vector.multi_reduction <add>, %14, %cst_11 [1] : vector<8x8xf32> to vector<8xf32>
    %16 = vector.shape_cast %15 : vector<8xf32> to vector<8x1xf32>
    %17 = tpu.reciprocal %16 {approx = true} : vector<8x1xf32> -> vector<8x1xf32>
    %18 = vector.broadcast %17 : vector<8x1xf32> to vector<8x8xf32>
    %19 = arith.mulf %14, %18 : vector<8x8xf32>
    %c0_12 = arith.constant 0 : index
    %c0_13 = arith.constant 0 : index
    %c0_14 = arith.constant 0 : index
    %c0_15 = arith.constant 0 : index
    %20 = vector.load %arg7[%c0_12, %c0_13, %c0_14, %c0_15] : memref<1x4x8x8xf32, #tpu.memory_space<vmem>>, vector<1x1x8x8xf32>
    %21 = vector.shape_cast %20 : vector<1x1x8x8xf32> to vector<8x8xf32>
    %22 = vector.shape_cast %19 : vector<8x8xf32> to vector<1x1x8x8xf32>
    tpu.vector_store %arg7[%c0_12, %c0_13, %c0_14, %c0_15], %22 {strides = array<i32>} : memref<1x4x8x8xf32, #tpu.memory_space<vmem>>, vector<1x1x8x8xf32>,
    %cst_16 = arith.constant dense<0.000000e+00> : vector<8x8xf32>
    %23 = tpu.matmul %19, %8, %cst_16 {dimension_numbers = #tpu.dot_dimension_numbers<[1], [0], [0], [1], [0, 0, 1, 1], [], []>} : vector<8x8xf32>, vector<8x8xf32>, vector<8x8xf32> -> vector<8x8xf32>
    %c0_17 = arith.constant 0 : index
    %c0_18 = arith.constant 0 : index
    %24 = vector.load %arg4[%c0_17, %c0_18] : memref<32x32xf32, #tpu.memory_space<vmem>>, vector<8x32xf32>
    %cst_19 = arith.constant dense<0.000000e+00> : vector<8x32xf32>
    %25 = tpu.matmul %23, %24, %cst_19 {dimension_numbers = #tpu.dot_dimension_numbers<[1], [0], [0], [1], [0, 0, 1, 1], [], []>} : vector<8x8xf32>, vector<8x32xf32>, vector<8x32xf32> -> vector<8x32xf32>
    %26 = arith.addf %0, %25 : vector<8x32xf32>
    %c0_20 = arith.constant 0 : index
    %c0_21 = arith.constant 0 : index
    %c8 = arith.constant 8 : index
    %27 = vector.load %arg1[%c0_20, %c0_21, %c8] : memref<1x8x32xf32, #tpu.memory_space<vmem>>, vector<1x8x8xf32>
    %28 = vector.shape_cast %27 : vector<1x8x8xf32> to vector<8x8xf32>
    %cst_22 = arith.constant 0.353553385 : f32
    %29 = vector.broadcast %cst_22 : f32 to vector<8x8xf32>
    %30 = arith.mulf %28, %29 : vector<8x8xf32>
    %c0_23 = arith.constant 0 : index
    %c0_24 = arith.constant 0 : index
    %c8_25 = arith.constant 8 : index
    %31 = vector.load %arg2[%c0_23, %c0_24, %c8_25] : memref<1x8x32xf32, #tpu.memory_space<vmem>>, vector<1x8x8xf32>
    %32 = vector.shape_cast %31 : vector<1x8x8xf32> to vector<8x8xf32>
    %c0_26 = arith.constant 0 : index
    %c0_27 = arith.constant 0 : index
    %c8_28 = arith.constant 8 : index
    %33 = vector.load %arg3[%c0_26, %c0_27, %c8_28] : memref<1x8x32xf32, #tpu.memory_space<vmem>>, vector<1x8x8xf32>
    %34 = vector.shape_cast %33 : vector<1x8x8xf32> to vector<8x8xf32>
    %cst_29 = arith.constant dense<0.000000e+00> : vector<8x8xf32>
    %35 = tpu.matmul %30, %32, %cst_29 {dimension_numbers = #tpu.dot_dimension_numbers<[1], [1], [0], [0], [0, 0, 1, 0], [], []>} : vector<8x8xf32>, vector<8x8xf32>, vector<8x8xf32> -> vector<8x8xf32>
    %cst_30 = arith.constant dense<0xFF800000> : vector<8xf32>
    %36 = vector.multi_reduction <maximumf>, %35, %cst_30 [1] : vector<8x8xf32> to vector<8xf32>
    %37 = vector.shape_cast %36 : vector<8xf32> to vector<8x1xf32>
    %38 = vector.broadcast %37 : vector<8x1xf32> to vector<8x8xf32>
    %39 = arith.subf %35, %38 : vector<8x8xf32>
    %40 = math.exp %39 : vector<8x8xf32>
    %cst_31 = arith.constant dense<0.000000e+00> : vector<8xf32>
    %41 = vector.multi_reduction <add>, %40, %cst_31 [1] : vector<8x8xf32> to vector<8xf32>
    %42 = vector.shape_cast %41 : vector<8xf32> to vector<8x1xf32>
    %43 = tpu.reciprocal %42 {approx = true} : vector<8x1xf32> -> vector<8x1xf32>
    %44 = vector.broadcast %43 : vector<8x1xf32> to vector<8x8xf32>
    %45 = arith.mulf %40, %44 : vector<8x8xf32>
    %c0_32 = arith.constant 0 : index
    %c1 = arith.constant 1 : index
    %c0_33 = arith.constant 0 : index
    %c0_34 = arith.constant 0 : index
    %46 = vector.load %arg7[%c0_32, %c1, %c0_33, %c0_34] : memref<1x4x8x8xf32, #tpu.memory_space<vmem>>, vector<1x1x8x8xf32>
    %47 = vector.shape_cast %46 : vector<1x1x8x8xf32> to vector<8x8xf32>
    %48 = vector.shape_cast %45 : vector<8x8xf32> to vector<1x1x8x8xf32>
    tpu.vector_store %arg7[%c0_32, %c1, %c0_33, %c0_34], %48 {strides = array<i32>} : memref<1x4x8x8xf32, #tpu.memory_space<vmem>>, vector<1x1x8x8xf32>,
    %cst_35 = arith.constant dense<0.000000e+00> : vector<8x8xf32>
    %49 = tpu.matmul %45, %34, %cst_35 {dimension_numbers = #tpu.dot_dimension_numbers<[1], [0], [0], [1], [0, 0, 1, 1], [], []>} : vector<8x8xf32>, vector<8x8xf32>, vector<8x8xf32> -> vector<8x8xf32>
    %c8_36 = arith.constant 8 : index
    %c0_37 = arith.constant 0 : index
    %50 = vector.load %arg4[%c8_36, %c0_37] : memref<32x32xf32, #tpu.memory_space<vmem>>, vector<8x32xf32>
    %cst_38 = arith.constant dense<0.000000e+00> : vector<8x32xf32>
    %51 = tpu.matmul %49, %50, %cst_38 {dimension_numbers = #tpu.dot_dimension_numbers<[1], [0], [0], [1], [0, 0, 1, 1], [], []>} : vector<8x8xf32>, vector<8x32xf32>, vector<8x32xf32> -> vector<8x32xf32>
    %52 = arith.addf %26, %51 : vector<8x32xf32>
    %c0_39 = arith.constant 0 : index
    %c0_40 = arith.constant 0 : index
    %c16 = arith.constant 16 : index
    %53 = vector.load %arg1[%c0_39, %c0_40, %c16] : memref<1x8x32xf32, #tpu.memory_space<vmem>>, vector<1x8x8xf32>
    %54 = vector.shape_cast %53 : vector<1x8x8xf32> to vector<8x8xf32>
    %cst_41 = arith.constant 0.353553385 : f32
    %55 = vector.broadcast %cst_41 : f32 to vector<8x8xf32>
    %56 = arith.mulf %54, %55 : vector<8x8xf32>
    %c0_42 = arith.constant 0 : index
    %c0_43 = arith.constant 0 : index
    %c16_44 = arith.constant 16 : index
    %57 = vector.load %arg2[%c0_42, %c0_43, %c16_44] : memref<1x8x32xf32, #tpu.memory_space<vmem>>, vector<1x8x8xf32>
    %58 = vector.shape_cast %57 : vector<1x8x8xf32> to vector<8x8xf32>
    %c0_45 = arith.constant 0 : index
    %c0_46 = arith.constant 0 : index
    %c16_47 = arith.constant 16 : index
    %59 = vector.load %arg3[%c0_45, %c0_46, %c16_47] : memref<1x8x32xf32, #tpu.memory_space<vmem>>, vector<1x8x8xf32>
    %60 = vector.shape_cast %59 : vector<1x8x8xf32> to vector<8x8xf32>
    %cst_48 = arith.constant dense<0.000000e+00> : vector<8x8xf32>
    %61 = tpu.matmul %56, %58, %cst_48 {dimension_numbers = #tpu.dot_dimension_numbers<[1], [1], [0], [0], [0, 0, 1, 0], [], []>} : vector<8x8xf32>, vector<8x8xf32>, vector<8x8xf32> -> vector<8x8xf32>
    %cst_49 = arith.constant dense<0xFF800000> : vector<8xf32>
    %62 = vector.multi_reduction <maximumf>, %61, %cst_49 [1] : vector<8x8xf32> to vector<8xf32>
    %63 = vector.shape_cast %62 : vector<8xf32> to vector<8x1xf32>
    %64 = vector.broadcast %63 : vector<8x1xf32> to vector<8x8xf32>
    %65 = arith.subf %61, %64 : vector<8x8xf32>
    %66 = math.exp %65 : vector<8x8xf32>
    %cst_50 = arith.constant dense<0.000000e+00> : vector<8xf32>
    %67 = vector.multi_reduction <add>, %66, %cst_50 [1] : vector<8x8xf32> to vector<8xf32>
    %68 = vector.shape_cast %67 : vector<8xf32> to vector<8x1xf32>
    %69 = tpu.reciprocal %68 {approx = true} : vector<8x1xf32> -> vector<8x1xf32>
    %70 = vector.broadcast %69 : vector<8x1xf32> to vector<8x8xf32>
    %71 = arith.mulf %66, %70 : vector<8x8xf32>
    %c0_51 = arith.constant 0 : index
    %c2 = arith.constant 2 : index
    %c0_52 = arith.constant 0 : index
    %c0_53 = arith.constant 0 : index
    %72 = vector.load %arg7[%c0_51, %c2, %c0_52, %c0_53] : memref<1x4x8x8xf32, #tpu.memory_space<vmem>>, vector<1x1x8x8xf32>
    %73 = vector.shape_cast %72 : vector<1x1x8x8xf32> to vector<8x8xf32>
    %74 = vector.shape_cast %71 : vector<8x8xf32> to vector<1x1x8x8xf32>
    tpu.vector_store %arg7[%c0_51, %c2, %c0_52, %c0_53], %74 {strides = array<i32>} : memref<1x4x8x8xf32, #tpu.memory_space<vmem>>, vector<1x1x8x8xf32>,
    %cst_54 = arith.constant dense<0.000000e+00> : vector<8x8xf32>
    %75 = tpu.matmul %71, %60, %cst_54 {dimension_numbers = #tpu.dot_dimension_numbers<[1], [0], [0], [1], [0, 0, 1, 1], [], []>} : vector<8x8xf32>, vector<8x8xf32>, vector<8x8xf32> -> vector<8x8xf32>
    %c16_55 = arith.constant 16 : index
    %c0_56 = arith.constant 0 : index
    %76 = vector.load %arg4[%c16_55, %c0_56] : memref<32x32xf32, #tpu.memory_space<vmem>>, vector<8x32xf32>
    %cst_57 = arith.constant dense<0.000000e+00> : vector<8x32xf32>
    %77 = tpu.matmul %75, %76, %cst_57 {dimension_numbers = #tpu.dot_dimension_numbers<[1], [0], [0], [1], [0, 0, 1, 1], [], []>} : vector<8x8xf32>, vector<8x32xf32>, vector<8x32xf32> -> vector<8x32xf32>
    %78 = arith.addf %52, %77 : vector<8x32xf32>
    %c0_58 = arith.constant 0 : index
    %c0_59 = arith.constant 0 : index
    %c24 = arith.constant 24 : index
    %79 = vector.load %arg1[%c0_58, %c0_59, %c24] : memref<1x8x32xf32, #tpu.memory_space<vmem>>, vector<1x8x8xf32>
    %80 = vector.shape_cast %79 : vector<1x8x8xf32> to vector<8x8xf32>
    %cst_60 = arith.constant 0.353553385 : f32
    %81 = vector.broadcast %cst_60 : f32 to vector<8x8xf32>
    %82 = arith.mulf %80, %81 : vector<8x8xf32>
    %c0_61 = arith.constant 0 : index
    %c0_62 = arith.constant 0 : index
    %c24_63 = arith.constant 24 : index
    %83 = vector.load %arg2[%c0_61, %c0_62, %c24_63] : memref<1x8x32xf32, #tpu.memory_space<vmem>>, vector<1x8x8xf32>
    %84 = vector.shape_cast %83 : vector<1x8x8xf32> to vector<8x8xf32>
    %c0_64 = arith.constant 0 : index
    %c0_65 = arith.constant 0 : index
    %c24_66 = arith.constant 24 : index
    %85 = vector.load %arg3[%c0_64, %c0_65, %c24_66] : memref<1x8x32xf32, #tpu.memory_space<vmem>>, vector<1x8x8xf32>
    %86 = vector.shape_cast %85 : vector<1x8x8xf32> to vector<8x8xf32>
    %cst_67 = arith.constant dense<0.000000e+00> : vector<8x8xf32>
    %87 = tpu.matmul %82, %84, %cst_67 {dimension_numbers = #tpu.dot_dimension_numbers<[1], [1], [0], [0], [0, 0, 1, 0], [], []>} : vector<8x8xf32>, vector<8x8xf32>, vector<8x8xf32> -> vector<8x8xf32>
    %cst_68 = arith.constant dense<0xFF800000> : vector<8xf32>
    %88 = vector.multi_reduction <maximumf>, %87, %cst_68 [1] : vector<8x8xf32> to vector<8xf32>
    %89 = vector.shape_cast %88 : vector<8xf32> to vector<8x1xf32>
    %90 = vector.broadcast %89 : vector<8x1xf32> to vector<8x8xf32>
    %91 = arith.subf %87, %90 : vector<8x8xf32>
    %92 = math.exp %91 : vector<8x8xf32>
    %cst_69 = arith.constant dense<0.000000e+00> : vector<8xf32>
    %93 = vector.multi_reduction <add>, %92, %cst_69 [1] : vector<8x8xf32> to vector<8xf32>
    %94 = vector.shape_cast %93 : vector<8xf32> to vector<8x1xf32>
    %95 = tpu.reciprocal %94 {approx = true} : vector<8x1xf32> -> vector<8x1xf32>
    %96 = vector.broadcast %95 : vector<8x1xf32> to vector<8x8xf32>
    %97 = arith.mulf %92, %96 : vector<8x8xf32>
    %c0_70 = arith.constant 0 : index
    %c3 = arith.constant 3 : index
    %c0_71 = arith.constant 0 : index
    %c0_72 = arith.constant 0 : index
    %98 = vector.load %arg7[%c0_70, %c3, %c0_71, %c0_72] : memref<1x4x8x8xf32, #tpu.memory_space<vmem>>, vector<1x1x8x8xf32>
    %99 = vector.shape_cast %98 : vector<1x1x8x8xf32> to vector<8x8xf32>
    %100 = vector.shape_cast %97 : vector<8x8xf32> to vector<1x1x8x8xf32>
    tpu.vector_store %arg7[%c0_70, %c3, %c0_71, %c0_72], %100 {strides = array<i32>} : memref<1x4x8x8xf32, #tpu.memory_space<vmem>>, vector<1x1x8x8xf32>,
    %cst_73 = arith.constant dense<0.000000e+00> : vector<8x8xf32>
    %101 = tpu.matmul %97, %86, %cst_73 {dimension_numbers = #tpu.dot_dimension_numbers<[1], [0], [0], [1], [0, 0, 1, 1], [], []>} : vector<8x8xf32>, vector<8x8xf32>, vector<8x8xf32> -> vector<8x8xf32>
    %c24_74 = arith.constant 24 : index
    %c0_75 = arith.constant 0 : index
    %102 = vector.load %arg4[%c24_74, %c0_75] : memref<32x32xf32, #tpu.memory_space<vmem>>, vector<8x32xf32>
    %cst_76 = arith.constant dense<0.000000e+00> : vector<8x32xf32>
    %103 = tpu.matmul %101, %102, %cst_76 {dimension_numbers = #tpu.dot_dimension_numbers<[1], [0], [0], [1], [0, 0, 1, 1], [], []>} : vector<8x8xf32>, vector<8x32xf32>, vector<8x32xf32> -> vector<8x32xf32>
    %104 = arith.addf %78, %103 : vector<8x32xf32>
    %c0_77 = arith.constant 0 : index
    %c0_78 = arith.constant 0 : index
    %105 = vector.load %arg5[%c0_77, %c0_78] : memref<1x32xf32, #tpu.memory_space<vmem>>, vector<1x32xf32>
    %106 = vector.broadcast %105 : vector<1x32xf32> to vector<8x32xf32>
    %107 = arith.addf %104, %106 : vector<8x32xf32>
    %c0_79 = arith.constant 0 : index
    %c0_80 = arith.constant 0 : index
    %c0_81 = arith.constant 0 : index
    %108 = vector.load %arg6[%c0_79, %c0_80, %c0_81] : memref<1x8x32xf32, #tpu.memory_space<vmem>>, vector<1x8x32xf32>
    %109 = vector.shape_cast %108 : vector<1x8x32xf32> to vector<8x32xf32>
    %110 = vector.shape_cast %107 : vector<8x32xf32> to vector<1x8x32xf32>
    tpu.vector_store %arg6[%c0_79, %c0_80, %c0_81], %110 {strides = array<i32>} : memref<1x8x32xf32, #tpu.memory_space<vmem>>, vector<1x8x32xf32>,
    return
  }
  func.func @transform_0(%arg0: i32) -> (i32, i32, i32) {
    %c0_i32 = arith.constant 0 : i32
    %c0_i32_0 = arith.constant 0 : i32
    %c0_i32_1 = arith.constant 0 : i32
    return %arg0, %c0_i32, %c0_i32_0 : i32, i32, i32
  }
  func.func @transform_1(%arg0: i32) -> (i32, i32, i32) {
    %c0_i32 = arith.constant 0 : i32
    %c0_i32_0 = arith.constant 0 : i32
    %c0_i32_1 = arith.constant 0 : i32
    return %arg0, %c0_i32, %c0_i32_0 : i32, i32, i32
  }
  func.func @transform_2(%arg0: i32) -> (i32, i32, i32) {
    %c0_i32 = arith.constant 0 : i32
    %c0_i32_0 = arith.constant 0 : i32
    %c0_i32_1 = arith.constant 0 : i32
    return %arg0, %c0_i32, %c0_i32_0 : i32, i32, i32
  }
  func.func @transform_3(%arg0: i32) -> (i32, i32) {
    %c0_i32 = arith.constant 0 : i32
    %c0_i32_0 = arith.constant 0 : i32
    %c0_i32_1 = arith.constant 0 : i32
    return %c0_i32, %c0_i32_0 : i32, i32
  }
  func.func @transform_4(%arg0: i32) -> (i32, i32) {
    %c0_i32 = arith.constant 0 : i32
    %c0_i32_0 = arith.constant 0 : i32
    %c0_i32_1 = arith.constant 0 : i32
    return %c0_i32, %c0_i32_0 : i32, i32
  }
  func.func @transform_5(%arg0: i32) -> (i32, i32, i32) {
    %c0_i32 = arith.constant 0 : i32
    %c0_i32_0 = arith.constant 0 : i32
    %c0_i32_1 = arith.constant 0 : i32
    return %arg0, %c0_i32, %c0_i32_0 : i32, i32, i32
  }
  func.func @transform_6(%arg0: i32) -> (i32, i32, i32, i32) {
    %c0_i32 = arith.constant 0 : i32
    %c0_i32_0 = arith.constant 0 : i32
    %c0_i32_1 = arith.constant 0 : i32
    %c0_i32_2 = arith.constant 0 : i32
    return %arg0, %c0_i32, %c0_i32_0, %c0_i32_1 : i32, i32, i32, i32
  }
}

</mosaic_0001>

<bundles_post_ra>
// kernel: tpu_custom_call.1
= control target key start
LH: loop header
LB: loop body
LE: loop exit
PB: predicated region body
PF: predicated region fallthrough
CT: control target
= control target key end

     0   :  { %s1630_s0 = inlined_call_operand.hbm [shape: f32[2,8,32], index: 0, kind: input, shape index: {}]   ;;  %s1631_s1 = inlined_call_operand.hbm [shape: f32[2,8,32], index: 1, kind: input, shape index: {}]   ;;  %s1632_s2 = inlined_call_operand.hbm [shape: f32[2,8,32], index: 2, kind: input, shape index: {}]   ;;  %s1633_s3 = inlined_call_operand.hbm [shape: f32[32,32], index: 3, kind: input, shape index: {}]   ;;  %s1634_s4 = inlined_call_operand.vmem [shape: f32[1,32], index: 4, kind: input, shape index: {}]   ;;  %s1635_s5 = inlined_call_operand.hbm [shape: f32[2,8,32], index: 5, kind: output, shape index: {0}]   ;;  %s1636_s6 = inlined_call_operand.hbm [shape: f32[2,4,8,8], index: 6, kind: output, shape index: {1}]  }
   0x1   :  { %1642 = sst [smem:[#allocation22_spill]] %s1631_s1 }
   0x2   :  { %1643 = sst [smem:[#allocation23_spill]] %s1633_s3 }
   0x3   :  { %12 = vsyncpa [#allocation3], 0 }
   0x4   :  { %14 = vsyncpa [#allocation3 + $0x1], 0 }
   0x5   :  { %15 = vsyncpa [#allocation6], 0 }
   0x6   :  { %17 = vsyncpa [#allocation6 + $0x1], 0 }
   0x7   :  { %18 = vsyncpa [#allocation9], 0 }
   0x8   :  { %19 = vsyncpa [#allocation4], 0 }
   0x9   :  { %21 = vsyncpa [#allocation4 + $0x1], 0 }
   0xa   :  { %22 = vsyncpa [#allocation12], 0 }
   0xb   :  { %24 = vsyncpa [#allocation12 + $0x1], 0  ;;  %s1370_s21 = smov 0   ;;  %s1372_s22 = smov 0  }
   0xc   :  { %s1374_s23 = smov 0   ;;  %s1376_s24 = smov 0  }
   0xd LB: > { %1644 = sst [smem:[#allocation18_spill]] %s1325_s24  ;;  %s1391_s25 = sadd.s32 4294967295, %s1325_s24   ;;  %s1325_s24 = sphi %s1376_s24, %s1659_s24   ;;  %s1321_s23 = sphi %s1374_s23, %s1663_s23   ;;  %s1317_s22 = sphi %s1372_s22, %s1662_s22   ;;  %s1313_s21 = sphi %s1370_s21, %s1661_s21  }
   0xe   : > { %s959_s26 = sadd.s32 4294967294, %s1325_s24   ;;  %s1395_s27 = sadd.s32 1, %s1325_s24  }
   0xf   : > { %1645 = sst [smem:[#allocation19_spill]] %s1395_s27  ;;  %s37_s28 = sadd.s32 1, %s1321_s23 }
  0x10   : > { %s34_s29 = ssub.s32 %s1325_s24, %s1395_s27  ;;  %p44_p0 = scmp.ne.s32.totalorder %s1321_s23, %s1317_s22 }
  0x11   : > { %p35_p1 = scmp.eq.s32.totalorder %s34_s29, 0  ;;  %p45_p2 = scmp.eq.s32.totalorder %s1325_s24, 0 }
  0x12   : > { %p50_p3 = scmp.ne.s32.totalorder %s1317_s22, %s1313_s21  ;;  %p168_p4 = scmp.eq.s32.totalorder %s1391_s25, 1 }
  0x13   : > { %s1407_s30 = scalar_select %p35_p1, %s1321_s23, %s37_s28  }
  0x14   : > { %p46_p5 = por %p45_p2, %p44_p0  ;;  %p1409_p6 = por %p168_p4, %p44_p0 }
  0x15   : > { %1646 = sst [smem:[#allocation20_spill]] %s1407_s30  ;;  %p174_p7 = scmp.eq.s32.totalorder %s959_s26, 1 }
  0x16   : > { %p1039_p9 = scmp.lt.s32.totalorder %s1325_s24, 2  ;;  %s1637_s9 = sand.u32 1, %s1321_s23  }
  0x17   : > { %p1418_p10 = por %p174_p7, %p50_p3  ;;  %s1425_s10 = sshll.u32 %s1637_s9, 3 }
  0x18   : > { %s1428_s11 = sshll.u32 %s1325_s24, 3  ;;  %p1430_p11 = pnand %p1039_p9, %p46_p5 }
  0x19   : > { %s1648_s8 = scalar_select %p1418_p10, 1, 0 }
  0x1a   : > { %s256_s13 = sand.u32 1, %s1325_s24   ;;  %s1651_s1 = sld [smem:[#allocation22_spill]] }
  0x1b   : > { %1649 = sst [smem:[#allocation21_spill]] %s1648_s8  ;;  %s260_s18 = scalar_lea.vmem [#allocation5], %s1425_s10 }
  0x1c   : > { %s268_s19 = sshll.u32 %s260_s18, 4  ;;  %s1440_s20 = scalar_lea.sflag [#allocation6], %s256_s13  ;;  %s269_s19 = int_to_ptr.vmem [resolvable:$true] %s268_s19 }
  0x1d   : > { %p1103_p13 = pneg %p1430_p11 }
  0x20   : > { %s264_s16 = scalar_lea.hbm %s1651_s1, %s1428_s11  ;;  %s1106_s15 = scalar_lea.hbm %s1651_s1, 16 }
  0x21   : > { %s266_s17 = sshll.u32 %s264_s16, 4  ;;  %s267_s17 = int_to_ptr.hbm [resolvable:$true] %s266_s17 }
  0x22   : > { %s1099_s26 = sshra.s32 %s267_s17, 4  ;;  %s1100_s26 = int_to_ptr.hbm [resolvable:$true] %s1099_s26 }
  0x23   : > { %s1101_s28 = scalar_lea.hbm %s1100_s26, 8  ;;  %p1107_p2 = scmp.lt.s32.totalorder %s1100_s26, %s1651_s1 }
  0x24   : > { %p1102_p12 = scmp.ne.s32.totalorder %s1100_s26, %s1101_s28  ;;  %p1108_p4 = scmp.lt.s32.totalorder %s1106_s15, %s1101_s28 }
  0x26   : > { %p1104_p0 = pnand %p1103_p13, %p1102_p12  ;;  %p1109_p5 = por %p1108_p4, %p1107_p2 }
  0x28   : > { %p1105_p1 = pneg %p1104_p0 }
  0x2a   : > { %p1110_p7 = pnand %p1109_p5, %p1105_p1 }
  0x2c   : > { %1113 = shalt.err (!%p1110_p7)
}
  0x2d   : > { %1027 = dma.hbm_to_vmem [thread:$0]  (!%p1430_p11), %s267_s17, 128, %s269_s19, %s1440_s20  }
  0x2e   : > { %p51_p9 = scmp.eq.s32.totalorder %s1391_s25, 0  ;;  %p960_p12 = scmp.ge.s32.totalorder %s1325_s24, 1 }
  0x2f   : > { %p207_p0 = scmp.lt.s32.totalorder %s1325_s24, 3  ;;  %s1652_s3 = sld [smem:[#allocation23_spill]] }
  0x30   : > { %p1467_p1 = por %p51_p9, %p50_p3  ;;  %s1327_s17 = smov [#allocation8]  }
  0x31   : > { %p1471_p2 = pnand %p960_p12, %p207_p0  ;;  %s220_s19 = sshll.u32 %s1327_s17, 4  ;;  %s221_s19 = int_to_ptr.vmem [resolvable:$true] %s220_s19 }
  0x32   : > { %s245_s18 = scalar_lea.hbm %s1630_s0, %s1428_s11  ;;  %s241_s13 = scalar_lea.vmem [#allocation2], %s1425_s10 }
  0x33   : > { %p1017_p4 = pneg %p1471_p2  ;;  %s249_s26 = sshll.u32 %s241_s13, 4  ;;  %s250_s26 = int_to_ptr.vmem [resolvable:$true] %s249_s26 }
  0x34   : > { %s247_s9 = sshll.u32 %s245_s18, 4  ;;  %s1328_s1 = smov 128   ;;  %s248_s9 = int_to_ptr.hbm [resolvable:$true] %s247_s9 }
  0x35   : > { %s218_s28 = sshll.u32 %s1652_s3, 4  ;;  %p1018_p5 = pnand %p1017_p4, %p51_p9  ;;  %s219_s28 = int_to_ptr.hbm [resolvable:$true] %s218_s28 }
  0x36   : > { %s1329_s3 = smov 8   ;;  %s1655_s30 = sand.u32 1, %s1321_s23  }
  0x37   : > { %1020 = dma.hbm_to_vmem [thread:$0]  (!%p1018_p5), %s219_s28, 512, %s221_s19, [#allocation9], %s1328_s1, %s1328_s1, %s1329_s3  }
  0x38   : > { %s238_s17 = scalar_lea.sflag [#allocation3], %s1655_s30  ;;  %s1159_s27 = sshra.s32 %s248_s9, 4  ;;  %s1160_s27 = int_to_ptr.hbm [resolvable:$true] %s1159_s27 }
  0x39   : > { %s1161_s24 = scalar_lea.hbm %s1160_s27, 8  ;;  %s1166_s13 = scalar_lea.hbm %s1630_s0, 16 }
  0x3a   : > { %p1162_p3 = scmp.ne.s32.totalorder %s1160_s27, %s1161_s24  ;;  %p1167_p0 = scmp.lt.s32.totalorder %s1160_s27, %s1630_s0 }
  0x3b   : > { %p1168_p4 = scmp.lt.s32.totalorder %s1166_s13, %s1161_s24 }
  0x3c   : > { %p1164_p7 = pnand %p1162_p3, %p1103_p13 }
  0x3d   : > { %p1169_p5 = por %p1168_p4, %p1167_p0 }
  0x3e   : > { %p1165_p12 = pneg %p1164_p7 }
  0x40   : > { %p1170_p8 = pnand %p1169_p5, %p1165_p12 }
  0x42   : > { %1173 = shalt.err (!%p1170_p8)
}
  0x43   : > { %1024 = dma.hbm_to_vmem [thread:$0]  (!%p1430_p11), %s248_s9, 128, %s250_s26, %s238_s17  }
  0x44   : > { %s283_s30 = scalar_lea.hbm %s1632_s2, %s1428_s11  ;;  %s279_s19 = scalar_lea.vmem [#allocation7], %s1425_s10 }
  0x45   : > { %s285_s28 = sshll.u32 %s283_s30, 4  ;;  %s287_s15 = sshll.u32 %s279_s19, 4  ;;  %s286_s28 = int_to_ptr.hbm [resolvable:$true] %s285_s28  ;;  %s288_s15 = int_to_ptr.vmem [resolvable:$true] %s287_s15 }
  0x46   : > { %s1189_s27 = sshra.s32 %s286_s28, 4  ;;  %s1196_s9 = scalar_lea.hbm %s1632_s2, 16  ;;  %s1190_s27 = int_to_ptr.hbm [resolvable:$true] %s1189_s27 }
  0x47   : > { %s1191_s24 = scalar_lea.hbm %s1190_s27, 8  ;;  %p1197_p12 = scmp.lt.s32.totalorder %s1190_s27, %s1632_s2 }
  0x48   : > { %p1192_p3 = scmp.ne.s32.totalorder %s1190_s27, %s1191_s24  ;;  %p1198_p0 = scmp.lt.s32.totalorder %s1196_s9, %s1191_s24 }
  0x4a   : > { %p1194_p8 = pnand %p1192_p3, %p1103_p13  ;;  %p1199_p4 = por %p1198_p0, %p1197_p12 }
  0x4c   : > { %p1195_p7 = pneg %p1194_p8 }
  0x4e   : > { %p1200_p5 = pnand %p1199_p4, %p1195_p7 }
  0x50   : > { %1203 = shalt.err (!%p1200_p5)
}
  0x51   : > { %1030 = dma.hbm_to_vmem [thread:$0]  (!%p1430_p11), %s286_s28, 128, %s288_s15, %s1440_s20  }
  0x52   : > { %296 = sbr.rel (%p1471_p2) target bundleno = 1270 (0x4f6), region = 40  ;;  %s1517_s10 = sand.u32 (!%p1471_p2), 1, %s1317_s22  }
  0x53   : > { %s1520_s11 = sshll.u32 (!%p1471_p2), %s1517_s10, 3  ;;  %s299_s13 = scalar_lea.sflag (!%p1471_p2), [#allocation3], %s1517_s10 }
  0x54   : > { %s302_s18 = scalar_lea.vmem (!%p1471_p2), [#allocation2], %s1520_s11 }
  0x57   : > { %1292 = dma.done.wait (%p1467_p1), %s299_s13, 128  }
  0x58   : > { %1294 = vsyncadd (%p1467_p1), %s299_s13, 4294967168  ;;  %s308_s12 = sand.u32 1, %s1391_s25   ;;  %s312_s14 = scalar_lea.vmem [#allocation5], %s1520_s11 }
  0x59   : > { %s309_s20 = scalar_lea.sflag [#allocation6], %s308_s12 }
  0x5a   : > { %1296 = dma.done.wait (%p1467_p1), %s309_s20, 256  }
  0x5b   : > { %1298 = vsyncadd (%p1467_p1), %s309_s20, 4294967040  ;;  %s322_s1 = scalar_lea.vmem [#allocation7], %s1520_s11 }
  0x5c   : > { %1300 = dma.done.wait (%p51_p9), [#allocation9], 512  }
  0x5d   : > { %1302 = vsyncadd (%p51_p9), [#allocation9], 4294966784  ;;  %vm376_vm0 = vcmask 64512   ;;  %v441_v0 = vld [vmem:[%s312_s14] sm:$0xff]  ;;  %v372_v1 = vld [vmem:[%s302_s18] sm:$0xff]  ;;  %s1330_s3 = smov 120  }
  0x5e   : > { %447 = vrot.lane.b32.xlu0 %v441_v0, %s1330_s3  ;;  %976 = vmatpush.xpose.msk.msra.mxu0 %vm376_vm0, %v441_v0  ;;  %v373_v2 = vmul.f32 0.35355338, %v372_v1  ;;  %v442_v3 = vld [vmem:[%s322_s1] sm:$0xff]  ;;  %s1331_s29 = smov 112   ;;  %s1332_s30 = smov 104   ;;  %v438_v33 = vld [vmem:[#allocation8] sm:$0xff] }
  0x5f   : > { %433 = vmatpush.msra.mxu1 %v442_v3  ;;  %s975_s28 = sshll.u32 %s1517_s10, 5  ;;  %v513_v44 = vld [vmem:[#allocation8 + $0x8] sm:$0xff]  ;;  %v634_v45 = vld [vmem:[#allocation8 + $0x10] sm:$0xff]  ;;  %v733_v57 = vld [vmem:[#allocation8 + $0x18] sm:$0xff]  ;;  %s1002_s27 = sshll.u32 %s1391_s25, 5 }
  0x60   : > { %s1553_s19 = scalar_lea.vmem [#allocation11], %s975_s28  ;;  %s796_s16 = scalar_lea.hbm %s1636_s6, %s1002_s27 }
  0x61   : > { %977 = vmatmul.msk.f32.vlgmr.msra.gmra.mxu0 %vm376_vm0, %v373_v2  ;;  %532 = vmatpush.msrb.mxu1 %v513_v44  ;;  %s797_s15 = sshll.u32 %s1553_s19, 4  ;;  %s799_s9 = sshll.u32 %s796_s16, 4  ;;  %s798_s15 = int_to_ptr.vmem [resolvable:$true] %s797_s15  ;;  %s800_s9 = int_to_ptr.hbm [resolvable:$true] %s799_s9 }
  0x62   : > { %s771_s26 = scalar_lea.sflag [#allocation12], %s1517_s10  ;;  %s1233_s17 = sshra.s32 %s800_s9, 4  ;;  %s1234_s17 = int_to_ptr.hbm [resolvable:$true] %s1233_s17 }
  0x63   : > { %s1235_s13 = scalar_lea.hbm %s1234_s17, 32  ;;  %s1239_s20 = scalar_lea.hbm %s1636_s6, 64 }
  0x64   : > { %p1236_p11 = scmp.ne.s32.totalorder %s1234_s17, %s1235_s13  ;;  %p1240_p1 = scmp.lt.s32.totalorder %s1234_s17, %s1636_s6 }
  0x65   : > { %p1241_p2 = scmp.lt.s32.totalorder %s1239_s20, %s1235_s13 }
  0x66   : > { %444 = vrot.lane.b32.xlu0 %v373_v2, %s1330_s3  ;;  %p1237_p13 = pnand %p1236_p11, %p1409_p6 }
  0x67   : > { %p1242_p3 = por %p1241_p2, %p1240_p1 }
  0x68   : > { %p1238_p9 = pneg %p1237_p13 }
  0x6a   : > { %p1243_p8 = pnand %p1242_p3, %p1238_p9 }
  0x6e   : > { %487 = vrot.lane.b32.xlu0 %v442_v3, %s1330_s3 }
  0x76   : > { %568 = vrot.lane.b32.xlu0 %v441_v0, %s1331_s29 }
  0x7e   : > { %565 = vrot.lane.b32.xlu0 %v373_v2, %s1331_s29 }
  0xd0   : > { %v448_v4 = vpop.permute.xlu0 %447 }
  0xd1   : > { %979 = vmatpush.xpose.msk.msra.mxu2 %vm376_vm0, %v448_v4 }
  0xd8   : > { %v445_v5 = vpop.permute.xlu0 %444 }
  0xd9   : > { %980 = vmatmul.msk.f32.vlgmr.msra.gmra.mxu2 %vm376_vm0, %v445_v5 }
  0xde   : > { %v400_v6 = vpop.f32.mrf.mxu0 }
  0xdf   : > { %v403_v7 = vsel %vm376_vm0, %v400_v6, -inf }
  0xe0   : > { %v488_v8 = vpop.permute.xlu0 %487  ;;  %404 = vmax.xlane.f32.xlu1 %v403_v7 }
  0xe1   : > { %508 = vmatpush.msra.mxu3 %v488_v8 }
  0xe3   : > { %555 = vmatpush.msrb.mxu3 %v438_v33 }
  0xe8   : > { %v569_v9 = vpop.permute.xlu0 %568 }
  0xe9   : > { %985 = vmatpush.xpose.msk.msrb.mxu0 %vm376_vm0, %v569_v9 }
  0xf0   : > { %v566_v10 = vpop.permute.xlu0 %565 }
  0xf1   : > { %986 = vmatmul.msk.f32.vlgmr.msrb.gmra.mxu0 %vm376_vm0, %v566_v10 }
 0x153   : > { %v405_v11 = vpop.xlane.xlu1 %404 }
 0x154   : > { %v406_v12 = vsub.f32 %v400_v6, %v405_v11 }
 0x156   : > { %v407_v13 = vmul.f32 1.442695, %v406_v12 }
 0x158   : > { %1083 = vpow2.f32 %v407_v13 }
 0x15c   : > { %v470_v14 = vpop.f32.mrf.mxu2 }
 0x15d   : > { %v473_v15 = vsel %vm376_vm0, %v470_v14, -inf }
 0x15e   : > { %v1084_v16 = vpop.eup %1083  ;;  %474 = vmax.xlane.f32.xlu2 %v473_v15 }
 0x15f   : > { %v409_v17 = vsel %vm376_vm0, %v1084_v16, 0.0 }
 0x160   : > { %410 = vadd.xlane.f32.xlu1 %v409_v17 }
 0x16e   : > { %v591_v18 = vpop.f32.mrf.mxu0 }
 0x16f   : > { %v594_v19 = vsel %vm376_vm0, %v591_v18, -inf }
 0x170   : > { %595 = vmax.xlane.f32.xlu0 %v594_v19 }
 0x179   : > { %667 = vrot.lane.b32.xlu1 %v441_v0, %s1332_s30 }
 0x184   : > { %608 = vrot.lane.b32.xlu0 %v442_v3, %s1331_s29 }
 0x1d1   : > { %v475_v20 = vpop.xlane.xlu2 %474 }
 0x1d2   : > { %v476_v21 = vsub.f32 %v470_v14, %v475_v20 }
 0x1d3   : > { %v411_v22 = vpop.xlane.xlu1 %410 }
 0x1d4   : > { %v477_v23 = vmul.f32 1.442695, %v476_v21  ;;  %1085 = vrcp.f32 %v411_v22 }
 0x1d6   : > { %1087 = vpow2.f32 %v477_v23 }
 0x1da   : > { %v1086_v24 = vpop.eup %1085 }
 0x1db   : > { %v413_v25 = vmul.f32 %v1086_v24, %v1084_v16 }
 0x1dc   : > { %v1088_v26 = vpop.eup %1087 }
 0x1dd   : > { %414 = vst.msk [vmem:[%s1553_s19] sm:$0xff] %vm376_vm0, %v413_v25  ;;  %978 = vmatmul.msk.f32.vlgmr.msra.gmra.mxu1 %vm376_vm0, %v413_v25  ;;  %v479_v27 = vsel %vm376_vm0, %v1088_v26, 0.0 }
 0x1de   : > { %480 = vadd.xlane.f32.xlu2 %v479_v27  ;;  %653 = vmatpush.msra.mxu1 %v634_v45 }
 0x1e3   : > { %v596_v28 = vpop.xlane.xlu0 %595 }
 0x1e4   : > { %v597_v29 = vsub.f32 %v591_v18, %v596_v28 }
 0x1e6   : > { %v598_v30 = vmul.f32 1.442695, %v597_v29 }
 0x1e8   : > { %1089 = vpow2.f32 %v598_v30 }
 0x1eb   : > { %v668_v38 = vpop.permute.xlu1 %667 }
 0x1ee   : > { %v1090_v31 = vpop.eup %1089 }
 0x1ef   : > { %v600_v32 = vsel %vm376_vm0, %v1090_v31, 0.0 }
 0x1f0   : > { %601 = vadd.xlane.f32.xlu1 %v600_v32 }
 0x1f6   : > { %664 = vrot.lane.b32.xlu2 %v373_v2, %s1332_s30  ;;  %v609_v34 = vpop.permute.xlu0 %608 }
 0x1f7   : > { %629 = vmatpush.msrb.mxu2 %v609_v34 }
 0x1f9   : > { %752 = vmatpush.msra.mxu2 %v733_v57 }
 0x209   : > { %707 = vrot.lane.b32.xlu1 %v442_v3, %s1332_s30 }
 0x251   : > { %v481_v35 = vpop.xlane.xlu2 %480 }
 0x252   : > { %1091 = vrcp.f32 %v481_v35 }
 0x258   : > { %v1092_v36 = vpop.eup %1091 }
 0x259   : > { %v483_v37 = vmul.f32 %v1092_v36, %v1088_v26  ;;  %v665_v41 = vpop.permute.xlu2 %664 }
 0x25a   : > { %v435_v39 = vpop.f32.mrf.mxu1 }
 0x25b   : > { %981 = vst.msk [vmem:[%s1553_s19 + $0x8] sm:$0xff] %vm376_vm0, %v483_v37  ;;  %982 = vmatmul.msk.f32.vlgmr.msra.gmra.mxu3 %vm376_vm0, %v483_v37 }
 0x25c   : > { %990 = vmatpush.xpose.msk.msra.mxu3 %vm376_vm0, %v668_v38 }
 0x263   : > { %984 = vmatmul.msk.f32.vlgmr.msrb.gmra.mxu3 %vm376_vm0, %v435_v39  ;;  %v602_v40 = vpop.xlane.xlu1 %601 }
 0x264   : > { %1093 = vrcp.f32 %v602_v40 }
 0x26a   : > { %v1094_v42 = vpop.eup %1093 }
 0x26b   : > { %991 = vmatmul.msk.f32.vlgmr.msra.gmra.mxu3 %vm376_vm0, %v665_v41  ;;  %v604_v43 = vmul.f32 %v1094_v42, %v1090_v31 }
 0x26d   : > { %987 = vst.msk [vmem:[%s1553_s19 + $0x10] sm:$0xff] %vm376_vm0, %v604_v43  ;;  %988 = vmatmul.msk.f32.vlgmr.msrb.gmra.mxu2 %vm376_vm0, %v604_v43 }
 0x27b   : > { %v708_v56 = vpop.permute.xlu1 %707 }
 0x27c   : > { %728 = vmatpush.msra.mxu0 %v708_v56 }
 0x2de   : > { %v510_v46 = vpop.f32.mrf.mxu3 }
 0x2df   : > { %983 = vmatmul.msk.f32.vlgmr.msrb.gmra.mxu1 %vm376_vm0, %v510_v46 }
 0x2e6   : > { %v557_v47 = vpop.f32.mrf.mxu3 }
 0x2ee   : > { %v690_v48 = vpop.f32.mrf.mxu3 }
 0x2ef   : > { %v693_v49 = vsel %vm376_vm0, %v690_v48, -inf }
 0x2f0   : > { %694 = vmax.xlane.f32.xlu2 %v693_v49  ;;  %v631_v50 = vpop.f32.mrf.mxu2 }
 0x2f1   : > { %989 = vmatmul.msk.f32.vlgmr.msra.gmra.mxu1 %vm376_vm0, %v631_v50 }
 0x363   : > { %v695_v51 = vpop.xlane.xlu2 %694 }
 0x364   : > { %v696_v52 = vsub.f32 %v690_v48, %v695_v51 }
 0x366   : > { %v697_v53 = vmul.f32 1.442695, %v696_v52 }
 0x368   : > { %1095 = vpow2.f32 %v697_v53 }
 0x36e   : > { %v1096_v54 = vpop.eup %1095 }
 0x36f   : > { %v699_v55 = vsel %vm376_vm0, %v1096_v54, 0.0 }
 0x370   : > { %700 = vadd.xlane.f32.xlu2 %v699_v55 }
 0x3e3   : > { %v701_v58 = vpop.xlane.xlu2 %700 }
 0x3e4   : > { %1097 = vrcp.f32 %v701_v58 }
 0x3ea   : > { %v1098_v59 = vpop.eup %1097 }
 0x3eb   : > { %v703_v60 = vmul.f32 %v1098_v59, %v1096_v54 }
 0x3ed   : > { %992 = vst.msk [vmem:[%s1553_s19 + $0x18] sm:$0xff] %vm376_vm0, %v703_v60  ;;  %993 = vmatmul.msk.f32.vlgmr.msra.gmra.mxu0 %vm376_vm0, %v703_v60 }
 0x46a   : > { %v730_v61 = vpop.f32.mrf.mxu0 }
 0x46b   : > { %994 = vmatmul.msk.f32.vlgmr.msra.gmra.mxu2 %vm376_vm0, %v730_v61 }
 0x46c   : > { %1246 = shalt.err (!%p1243_p8)
}
 0x46d   : > { %s1333_s3 = smov 128   ;;  %s1334_s29 = smov 8   ;;  %v534_v62 = vpop.f32.mrf.mxu1  ;;  %v1082_v2 = vld [vmem:[%s1634_s4] ss:$0 sm:$0xff]  ;;  %vm763_vm1 = vcmask 261120  }
 0x46e   : > { %1014 = dma.vmem_to_hbm [thread:$0]  (%p1409_p6), %s798_s15, 512, %s800_s9, %s771_s26, %s1333_s3, %s1333_s3, %s1334_s29   ;;  %v558_v0 = vadd.f32 %v557_v47, %v534_v62 }
 0x46f   : > { %s997_s30 = sshll.u32 %s1391_s25, 3  ;;  %s364_s16 = scalar_lea.vmem [#allocation10], %s1520_s11 }
 0x470   : > { %s781_s27 = scalar_lea.hbm %s1635_s5, %s997_s30  ;;  %s783_s17 = sshll.u32 %s364_s16, 4  ;;  %s784_s17 = int_to_ptr.vmem [resolvable:$true] %s783_s17 }
 0x471   : > { %s785_s13 = sshll.u32 %s781_s27, 4  ;;  %s766_s25 = scalar_lea.sflag [#allocation4], %s1517_s10  ;;  %s786_s13 = int_to_ptr.hbm [resolvable:$true] %s785_s13 }
 0x472   : > { %s1261_s15 = sshra.s32 %s786_s13, 4  ;;  %s1267_s11 = scalar_lea.hbm %s1635_s5, 16  ;;  %s1262_s15 = int_to_ptr.hbm [resolvable:$true] %s1261_s15 }
 0x473   : > { %s1263_s9 = scalar_lea.hbm %s1262_s15, 8  ;;  %p1268_p4 = scmp.lt.s32.totalorder %s1262_s15, %s1635_s5 }
 0x474   : > { %p1264_p7 = scmp.ne.s32.totalorder %s1262_s15, %s1263_s9  ;;  %p1269_p5 = scmp.lt.s32.totalorder %s1267_s11, %s1263_s9 }
 0x475   : > { %v655_v63 = vpop.f32.mrf.mxu1 }
 0x476   : > { %v658_v1 = vadd.f32 %v655_v63, %v558_v0  ;;  %p1265_p12 = pnand %p1264_p7, %p1409_p6  ;;  %p1270_p11 = por %p1269_p5, %p1268_p4 }
 0x478   : > { %p1266_p0 = pneg %p1265_p12 }
 0x47a   : > { %p1271_p13 = pnand %p1270_p11, %p1266_p0 }
 0x4ee   : > { %v754_v3 = vpop.f32.mrf.mxu2 }
 0x4ef   : > { %v757_v4 = vadd.f32 %v754_v3, %v658_v1 }
 0x4f1   : > { %v762_v5 = vadd.f32 %v1082_v2, %v757_v4 }
 0x4f3   : > { %764 = vst.msk [vmem:[%s364_s16] sm:$0xff] %vm763_vm1, %v762_v5 }
 0x4f4   : > { %1274 = shalt.err (!%p1271_p13)
}
 0x4f5   : > { %1013 = dma.vmem_to_hbm [thread:$0]  (%p1409_p6), %s784_s17, 128, %s786_s13, %s766_s25  }
 0x4f6 PF: > { %s1657_s14 = sld [smem:[#allocation18_spill]]  ;;  %s814_s1 = sand.u32 1, %s1313_s21  }
 0x4f7   : > { %s815_s3 = scalar_lea.sflag [#allocation4], %s814_s1 }
 0x4fc   : > { %p1658_p9 = scmp.ge.s32.totalorder %s1657_s14, 2 }
 0x4fe   : > { %p1032_p1 = pnand %p1658_p9, %p1418_p10 }
 0x500   : > { %p1033_p2 = pneg %p1032_p1 }
 0x502   : > { %1304 = dma.done.wait (%p1033_p2), %s815_s3, 128  }
 0x503   : > { %1306 = vsyncadd (%p1033_p2), %s815_s3, 4294967168  ;;  %s825_s29 = scalar_lea.sflag [#allocation12], %s814_s1 }
 0x504   : > { %1308 = dma.done.wait (%p1033_p2), %s825_s29, 512  }
 0x505   : > { %1310 = vsyncadd (%p1033_p2), %s825_s29, 4294966784  ;;  %s1659_s24 = sld [smem:[#allocation19_spill]]  ;;  %s1661_s21 = smov %s1317_s22 }
 0x506   : > { %s1660_s7 = sld [smem:[#allocation20_spill]]  ;;  %s1662_s22 = smov %s1321_s23 }
 0x50b   : > { %p27_p6 = scmp.ge.s32.totalorder %s1659_s24, 4  }
 0x50c   : > { %s1663_s23 = smov %s1660_s7 }
 0x50d   :  { %29 = sbr.rel (!%p27_p6) target bundleno = 13 (0xd), region = 133 }
 0x512   :  { %831 = vsyncpa [#allocation3], 1 }
 0x513   :  { %833 = vsyncpa [#allocation3 + $0x1], 1 }
 0x514   :  { %834 = vsyncpa [#allocation6], 1 }
 0x515   :  { %836 = vsyncpa [#allocation6 + $0x1], 1 }
 0x516   :  { %837 = vsyncpa [#allocation9], 1 }
 0x517   :  { %838 = vsyncpa [#allocation4], 1 }
 0x518   :  { %840 = vsyncpa [#allocation4 + $0x1], 1 }
 0x519   :  { %841 = vsyncpa [#allocation12], 1 }
 0x51a   :  { %843 = vsyncpa [#allocation12 + $0x1], 1 }

</bundles_post_ra>
